<compile_context>
chip_gen: v6e
topology: v6e:2x2x1
jax: 0.10.0
libtpu: 0.0.40
codegen_flags: <defaults>
</compile_context>

<pallas_src>
import functools
import math

import jax
import jax.numpy as jnp
from jax.experimental import pallas as pl
from jax.experimental.pallas import tpu as pltpu


# ----------------------------------------------------------------------------
# kl_annealing (pure-Python scalar schedule, faithful to the reference class)
# ----------------------------------------------------------------------------
class KLAnnealing:
    def __init__(self, args, current_epoch=0):
        self.args = args
        self.current_epoch = current_epoch
        self.kl_anneal_type = args["kl_anneal_type"]
        self.kl_anneal_cycle = args["kl_anneal_cycle"]
        self.kl_anneal_ratio = args["kl_anneal_ratio"]
        if self.kl_anneal_type == "Cyclical":
            self.beta = self._frange_cycle_linear(
                current_epoch, 0.0, self.kl_anneal_ratio, self.kl_anneal_cycle)
        elif self.kl_anneal_type == "Monotonic":
            self.beta = min(self.kl_anneal_ratio,
                            current_epoch / (self.kl_anneal_cycle * 0.5))
        else:
            self.beta = 1.0

    def get_beta(self):
        return self.beta

    def _frange_cycle_linear(self, n_iter, start, stop, n_cycle):
        cycle_length = self.args["num_epoch"] // n_cycle
        pos = n_iter % cycle_length
        half = cycle_length // 2
        if pos < half:
            return start + (stop - start) * (pos / half)
        return stop - (stop - start) * ((pos - half) / half)


# ----------------------------------------------------------------------------
# Tiling helpers
# ----------------------------------------------------------------------------
_MAX_TILE_BYTES = 4 * 1024 * 1024      # per-input VMEM block (per buffer)
_VMEM_LIMIT_BYTES = 40 * 1024 * 1024   # 4 inputs x 2 buffers x 4 MiB + headroom


def _round_up(x, m):
    return ((x + m - 1) // m) * m


def _sublane_multiple(dtypes):
    # f32 -> 8, bf16 -> 16, int8/fp8 -> 32 (sublane packing of the 2nd-minor dim)
    return max(max(8, 32 // jnp.dtype(d).itemsize) for d in dtypes)


def _pick_tile_rows(rows, dtypes):
    m = _sublane_multiple(dtypes)
    max_item = max(jnp.dtype(d).itemsize for d in dtypes)
    cap = max(m, (_MAX_TILE_BYTES // (128 * max_item)) // m * m)
    return min(cap, max(m, _round_up(rows, m)))


def _as_lane_slab(x):
    """Flatten to a (rows, 128) lane-dense slab WITHOUT copying (ravel+reshape)."""
    n = x.size
    flat = jnp.ravel(x)
    if n % 128 != 0:
        # TODO(synk): cold fallback — jnp.pad materializes a copy, but all tensors in
        # the VAE training loop (NCHW conv maps) have numel % 128 == 0.  Zero padding
        # contributes exactly 0 to both SSE and the KLD integrand, so it is harmless.
        flat = jnp.pad(flat, (0, 128 - n % 128))
    return flat.reshape(-1, 128)


# ----------------------------------------------------------------------------
# Fused Pallas kernel: SSE(pred, gt) and sum of KLD integrand, one launch,
# reductions finished in-kernel (scalars written to SMEM).
# ----------------------------------------------------------------------------
def _fused_loss_kernel(pred_ref, gt_ref, mu_ref, lv_ref, out_ref,
                       acc_sse, acc_kld, *,
                       n_grid, n_blk_sse, n_blk_kld,
                       rows_sse, rows_kld, t_sse, t_kld):
    i = pl.program_id(0)

    @pl.when(i == 0)
    def _init():
        acc_sse[...] = jnp.zeros_like(acc_sse)
        acc_kld[...] = jnp.zeros_like(acc_kld)

    def accumulate(acc, contrib_fn, n_blk, rows, t):
        """Fold one (t,128) block into an (8,128) accumulator (pure VALU adds)."""
        def fold(c):
            return c.reshape(t // 8, 8, 128).sum(axis=0)

        if rows % t != 0:
            # Ragged group: unmasked fast path for full blocks; the iota+select mask
            # only runs on the group's last block (cold path).
            @pl.when(i < n_blk - 1)
            def _full():
                acc[...] += fold(contrib_fn())

            @pl.when(i == n_blk - 1)
            def _tail():
                c = contrib_fn()
                row = jax.lax.broadcasted_iota(jnp.int32, c.shape, 0) + i * t
                acc[...] += fold(jnp.where(row < rows, c, 0.0))
        else:
            if n_blk == n_grid:
                acc[...] += fold(contrib_fn())
            else:
                # This group runs out of blocks before the grid ends; the clamped
                # index map re-reads its last block, so guard the accumulate.
                @pl.when(i < n_blk)
                def _guarded():
                    acc[...] += fold(contrib_fn())

    def sse_contrib():
        d = pred_ref[...].astype(jnp.float32) - gt_ref[...].astype(jnp.float32)
        return d * d

    def kld_contrib():
        mu = mu_ref[...].astype(jnp.float32)
        lv = lv_ref[...].astype(jnp.float32)
        return -0.5 * (1.0 + lv - mu * mu - jnp.exp(lv))

    accumulate(acc_sse, sse_contrib, n_blk_sse, rows_sse, t_sse)
    accumulate(acc_kld, kld_contrib, n_blk_kld, rows_kld, t_kld)

    @pl.when(i == n_grid - 1)
    def _finalize():
        # One full reduce per quantity, once, at the last grid step; scalars land in
        # SMEM so the wrapper does no trailing reduction kernel.
        out_ref[0] = jnp.sum(acc_sse[...])
        out_ref[1] = jnp.sum(acc_kld[...])


def _fused_loss_scalars(pred2d, gt2d, mu2d, lv2d):
    rows_sse = pred2d.shape[0]
    rows_kld = mu2d.shape[0]
    t_sse = _pick_tile_rows(rows_sse, (pred2d.dtype, gt2d.dtype))
    t_kld = _pick_tile_rows(rows_kld, (mu2d.dtype, lv2d.dtype))
    n_sse = pl.cdiv(rows_sse, t_sse)
    n_kld = pl.cdiv(rows_kld, t_kld)
    n_grid = max(n_sse, n_kld)

    kernel = functools.partial(
        _fused_loss_kernel,
        n_grid=n_grid, n_blk_sse=n_sse, n_blk_kld=n_kld,
        rows_sse=rows_sse, rows_kld=rows_kld, t_sse=t_sse, t_kld=t_kld)

    # Clamp the block index for the group that finishes first: the repeated block
    # index means Pallas skips the redundant DMA on the remaining iterations.
    def sse_map(i):
        return (jnp.minimum(i, n_sse - 1), 0)

    def kld_map(i):
        return (jnp.minimum(i, n_kld - 1), 0)

    return pl.pallas_call(
        kernel,
        out_shape=jax.ShapeDtypeStruct((2,), jnp.float32),
        grid_spec=pltpu.PrefetchScalarGridSpec(
            num_scalar_prefetch=0,
            grid=(n_grid,),
            in_specs=[
                pl.BlockSpec((t_sse, 128), sse_map),
                pl.BlockSpec((t_sse, 128), sse_map),
                pl.BlockSpec((t_kld, 128), kld_map),
                pl.BlockSpec((t_kld, 128), kld_map),
            ],
            out_specs=pl.BlockSpec(memory_space=pltpu.MemorySpace.SMEM),
            scratch_shapes=[
                pltpu.VMEM((8, 128), jnp.float32),   # SSE accumulator
                pltpu.VMEM((8, 128), jnp.float32),   # KLD accumulator
            ],
        ),
        compiler_params=pltpu.CompilerParams(
            dimension_semantics=("arbitrary",),       # resident accumulators
            vmem_limit_bytes=_VMEM_LIMIT_BYTES),
    )(pred2d, gt2d, mu2d, lv2d)


# ----------------------------------------------------------------------------
# Forward-pass loss pipeline (semantics of training_one_step / val_one_step)
# ----------------------------------------------------------------------------
@functools.partial(jax.jit, static_argnames=("batch_size",))
def vae_step_losses(pred_frame, gt_frame, mu, logvar, batch_size, beta):
    scalars = _fused_loss_scalars(
        _as_lane_slab(pred_frame), _as_lane_slab(gt_frame),
        _as_lane_slab(mu), _as_lane_slab(logvar))
    sse = scalars[0]
    kld_sum = scalars[1]

    # mse_loss = nn.MSELoss()(pred_frame, img[i])  (mean over all elements)
    mse = sse / pred_frame.size

    # kld = kl_criterion(mu, logvar, batch_size), with training_one_step's NaN guard
    kld = kld_sum / batch_size
    kld = jnp.where(jnp.isnan(kld) | jnp.isinf(kld), jnp.float32(0.5), kld)

    # Generate_PSNR(pred, gt, data_range=1.0)
    psnr = 20.0 * math.log10(1.0) - 10.0 * jnp.log10(mse)

    loss = mse + beta * kld
    return loss, mse, kld, psnr


# ----------------------------------------------------------------------------
# Demo / smoke test
# ----------------------------------------------------------------------------
if __name__ == "__main__":
    args = dict(kl_anneal_type="Full", kl_anneal_cycle=2,
                kl_anneal_ratio=1.0, num_epoch=10)
    beta = KLAnnealing(args, current_epoch=0).get_beta()  # -> 1.0

    key = jax.random.PRNGKey(0)
    k1, k2, k3, k4 = jax.random.split(key, 4)
    B, C, H, W = 2, 3, 16, 16      # NCHW frames (small)
    N_dim = 12                     # latent channel dim of Gaussian_Predictor

    pred_frame = jax.random.uniform(k1, (B, C, H, W), jnp.float32)
    gt_frame = jax.random.uniform(k2, (B, C, H, W), jnp.float32)
    mu = 0.1 * jax.random.normal(k3, (B, N_dim, H, W), jnp.float32)
    logvar = 0.1 * jax.random.normal(k4, (B, N_dim, H, W), jnp.float32)

    def ref_losses(p, g, m, lv, bs, b):
        mse_r = jnp.mean((p - g) ** 2)
        kld_r = -0.5 * jnp.sum(1.0 + lv - m ** 2 - jnp.exp(lv)) / bs
        psnr_r = -10.0 * jnp.log10(mse_r)
        return mse_r + b * kld_r, mse_r, kld_r, psnr_r

    # --- f32 path (exact reference check) ---
    loss, mse, kld, psnr = jax.block_until_ready(
        vae_step_losses(pred_frame, gt_frame, mu, logvar, B, jnp.float32(beta)))
    loss_r, mse_r, kld_r, psnr_r = ref_losses(pred_frame, gt_frame, mu, logvar, B, beta)
    assert jnp.allclose(mse, mse_r, rtol=1e-5, atol=1e-6)
    assert jnp.allclose(kld, kld_r, rtol=1e-5, atol=1e-6)
    assert jnp.allclose(psnr, psnr_r, rtol=1e-5, atol=1e-5)
    assert jnp.allclose(loss, loss_r, rtol=1e-5, atol=1e-5)

    # --- bf16 inputs (half the HBM traffic; exercises dtype-aware tile rounding) ---
    pred_bf = pred_frame.astype(jnp.bfloat16)
    gt_bf = gt_frame.astype(jnp.bfloat16)
    mu_bf = mu.astype(jnp.bfloat16)
    lv_bf = logvar.astype(jnp.bfloat16)
    loss_b, mse_b, kld_b, psnr_b = jax.block_until_ready(
        vae_step_losses(pred_bf, gt_bf, mu_bf, lv_bf, B, jnp.float32(beta)))
    loss_rb, mse_rb, kld_rb, _ = ref_losses(
        pred_bf.astype(jnp.float32), gt_bf.astype(jnp.float32),
        mu_bf.astype(jnp.float32), lv_bf.astype(jnp.float32), B, beta)
    assert jnp.allclose(mse_b, mse_rb, rtol=1e-4, atol=1e-6)
    assert jnp.allclose(kld_b, kld_rb, rtol=1e-4, atol=1e-5)
    assert jnp.allclose(loss_b, loss_rb, rtol=1e-4, atol=1e-5)

    print("KERNEL_OK")
</pallas_src>

<mosaic_0001>
module attributes {stable_mosaic.version = 11 : i64} {
  func.func @_fused_loss_kernel(%arg0: i32, %arg1: memref<16x128xf32, #tpu.memory_space<vmem>>, %arg2: memref<16x128xf32, #tpu.memory_space<vmem>>, %arg3: memref<48x128xf32, #tpu.memory_space<vmem>>, %arg4: memref<48x128xf32, #tpu.memory_space<vmem>>, %arg5: memref<2xf32, #tpu.memory_space<smem>>, %arg6: memref<8x128xf32, #tpu.memory_space<vmem>>, %arg7: memref<8x128xf32, #tpu.memory_space<vmem>>) attributes {dimension_semantics = [#tpu.dimension_semantics<arbitrary>], iteration_bounds = array<i64: 1>, scalar_prefetch = 0 : i64, scratch_operands = 2 : i64, tpu.core_type = #tpu.core_type<tc>, window_params = [{transform_indices = @transform_0, window_bounds = array<i64: 16, 128>}, {transform_indices = @transform_1, window_bounds = array<i64: 16, 128>}, {transform_indices = @transform_2, window_bounds = array<i64: 48, 128>}, {transform_indices = @transform_3, window_bounds = array<i64: 48, 128>}, {transform_indices = @transform_4, window_bounds = array<i64: 2>}]} {
    %c0_i32 = arith.constant 0 : i32
    %0 = arith.cmpi eq, %arg0, %c0_i32 : i32
    %1 = arith.extui %0 : i1 to i32
    %c0_i32_0 = arith.constant 0 : i32
    %2 = arith.cmpi ne, %1, %c0_i32_0 : i32
    scf.if %2 {
      %cst_16 = arith.constant 0.000000e+00 : f32
      %27 = vector.broadcast %cst_16 : f32 to vector<8x128xf32>
      %c0_17 = arith.constant 0 : index
      %c0_18 = arith.constant 0 : index
      %28 = vector.load %arg6[%c0_17, %c0_18] : memref<8x128xf32, #tpu.memory_space<vmem>>, vector<8x128xf32>
      tpu.vector_store %arg6[%c0_17, %c0_18], %27 {strides = array<i32>} : memref<8x128xf32, #tpu.memory_space<vmem>>, vector<8x128xf32>,
      %cst_19 = arith.constant 0.000000e+00 : f32
      %29 = vector.broadcast %cst_19 : f32 to vector<8x128xf32>
      %c0_20 = arith.constant 0 : index
      %c0_21 = arith.constant 0 : index
      %30 = vector.load %arg7[%c0_20, %c0_21] : memref<8x128xf32, #tpu.memory_space<vmem>>, vector<8x128xf32>
      tpu.vector_store %arg7[%c0_20, %c0_21], %29 {strides = array<i32>} : memref<8x128xf32, #tpu.memory_space<vmem>>, vector<8x128xf32>,
    } else {
    }
    %c0_i32_1 = arith.constant 0 : i32
    %3 = arith.cmpi slt, %arg0, %c0_i32_1 : i32
    %4 = arith.extui %3 : i1 to i32
    %c0_i32_2 = arith.constant 0 : i32
    %5 = arith.cmpi ne, %4, %c0_i32_2 : i32
    scf.if %5 {
      %c0_16 = arith.constant 0 : index
      %c0_17 = arith.constant 0 : index
      %27 = vector.load %arg6[%c0_16, %c0_17] : memref<8x128xf32, #tpu.memory_space<vmem>>, vector<8x128xf32>
      %c0_18 = arith.constant 0 : index
      %c0_19 = arith.constant 0 : index
      %28 = vector.load %arg1[%c0_18, %c0_19] : memref<16x128xf32, #tpu.memory_space<vmem>>, vector<16x128xf32>
      %c0_20 = arith.constant 0 : index
      %c0_21 = arith.constant 0 : index
      %29 = vector.load %arg2[%c0_20, %c0_21] : memref<16x128xf32, #tpu.memory_space<vmem>>, vector<16x128xf32>
      %30 = arith.subf %28, %29 : vector<16x128xf32>
      %31 = arith.mulf %30, %30 : vector<16x128xf32>
      %32 = vector.shape_cast %31 : vector<16x128xf32> to vector<2x8x128xf32>
      %cst_22 = arith.constant dense<0.000000e+00> : vector<8x128xf32>
      %33 = vector.multi_reduction <add>, %32, %cst_22 [0] : vector<2x8x128xf32> to vector<8x128xf32>
      %34 = arith.addf %27, %33 : vector<8x128xf32>
      %c0_23 = arith.constant 0 : index
      %c0_24 = arith.constant 0 : index
      %35 = vector.load %arg6[%c0_23, %c0_24] : memref<8x128xf32, #tpu.memory_space<vmem>>, vector<8x128xf32>
      tpu.vector_store %arg6[%c0_23, %c0_24], %34 {strides = array<i32>} : memref<8x128xf32, #tpu.memory_space<vmem>>, vector<8x128xf32>,
    } else {
    }
    %c0_i32_3 = arith.constant 0 : i32
    %6 = arith.cmpi eq, %arg0, %c0_i32_3 : i32
    %7 = arith.extui %6 : i1 to i32
    %c0_i32_4 = arith.constant 0 : i32
    %8 = arith.cmpi ne, %7, %c0_i32_4 : i32
    scf.if %8 {
      %c0_16 = arith.constant 0 : index
      %c0_17 = arith.constant 0 : index
      %27 = vector.load %arg1[%c0_16, %c0_17] : memref<16x128xf32, #tpu.memory_space<vmem>>, vector<16x128xf32>
      %c0_18 = arith.constant 0 : index
      %c0_19 = arith.constant 0 : index
      %28 = vector.load %arg2[%c0_18, %c0_19] : memref<16x128xf32, #tpu.memory_space<vmem>>, vector<16x128xf32>
      %29 = arith.subf %27, %28 : vector<16x128xf32>
      %30 = arith.mulf %29, %29 : vector<16x128xf32>
      %31 = tpu.iota {dimensions = array<i32: 0>} : vector<16x128xi32>
      %c16_i32 = arith.constant 16 : i32
      %32 = arith.muli %arg0, %c16_i32 : i32
      %33 = vector.broadcast %32 : i32 to vector<16x128xi32>
      %34 = arith.addi %31, %33 : vector<16x128xi32>
      %c0_20 = arith.constant 0 : index
      %c0_21 = arith.constant 0 : index
      %35 = vector.load %arg6[%c0_20, %c0_21] : memref<8x128xf32, #tpu.memory_space<vmem>>, vector<8x128xf32>
      %c12_i32 = arith.constant 12 : i32
      %36 = vector.broadcast %c12_i32 : i32 to vector<16x128xi32>
      %37 = arith.cmpi slt, %34, %36 : vector<16x128xi32>
      %cst_22 = arith.constant 0.000000e+00 : f32
      %38 = vector.broadcast %cst_22 : f32 to vector<16x128xf32>
      %39 = arith.select %37, %30, %38 : vector<16x128xi1>, vector<16x128xf32>
      %40 = vector.shape_cast %39 : vector<16x128xf32> to vector<2x8x128xf32>
      %cst_23 = arith.constant dense<0.000000e+00> : vector<8x128xf32>
      %41 = vector.multi_reduction <add>, %40, %cst_23 [0] : vector<2x8x128xf32> to vector<8x128xf32>
      %42 = arith.addf %35, %41 : vector<8x128xf32>
      %c0_24 = arith.constant 0 : index
      %c0_25 = arith.constant 0 : index
      %43 = vector.load %arg6[%c0_24, %c0_25] : memref<8x128xf32, #tpu.memory_space<vmem>>, vector<8x128xf32>
      tpu.vector_store %arg6[%c0_24, %c0_25], %42 {strides = array<i32>} : memref<8x128xf32, #tpu.memory_space<vmem>>, vector<8x128xf32>,
    } else {
    }
    %c0 = arith.constant 0 : index
    %c0_5 = arith.constant 0 : index
    %9 = vector.load %arg7[%c0, %c0_5] : memref<8x128xf32, #tpu.memory_space<vmem>>, vector<8x128xf32>
    %c0_6 = arith.constant 0 : index
    %c0_7 = arith.constant 0 : index
    %10 = vector.load %arg3[%c0_6, %c0_7] : memref<48x128xf32, #tpu.memory_space<vmem>>, vector<48x128xf32>
    %c0_8 = arith.constant 0 : index
    %c0_9 = arith.constant 0 : index
    %11 = vector.load %arg4[%c0_8, %c0_9] : memref<48x128xf32, #tpu.memory_space<vmem>>, vector<48x128xf32>
    %cst = arith.constant 1.000000e+00 : f32
    %12 = vector.broadcast %cst : f32 to vector<48x128xf32>
    %13 = arith.addf %12, %11 : vector<48x128xf32>
    %14 = arith.mulf %10, %10 : vector<48x128xf32>
    %15 = arith.subf %13, %14 : vector<48x128xf32>
    %16 = math.exp %11 : vector<48x128xf32>
    %17 = arith.subf %15, %16 : vector<48x128xf32>
    %cst_10 = arith.constant -5.000000e-01 : f32
    %18 = vector.broadcast %cst_10 : f32 to vector<48x128xf32>
    %19 = arith.mulf %18, %17 : vector<48x128xf32>
    %20 = vector.shape_cast %19 : vector<48x128xf32> to vector<6x8x128xf32>
    %cst_11 = arith.constant dense<0.000000e+00> : vector<8x128xf32>
    %21 = vector.multi_reduction <add>, %20, %cst_11 [0] : vector<6x8x128xf32> to vector<8x128xf32>
    %22 = arith.addf %9, %21 : vector<8x128xf32>
    %c0_12 = arith.constant 0 : index
    %c0_13 = arith.constant 0 : index
    %23 = vector.load %arg7[%c0_12, %c0_13] : memref<8x128xf32, #tpu.memory_space<vmem>>, vector<8x128xf32>
    tpu.vector_store %arg7[%c0_12, %c0_13], %22 {strides = array<i32>} : memref<8x128xf32, #tpu.memory_space<vmem>>, vector<8x128xf32>,
    %c0_i32_14 = arith.constant 0 : i32
    %24 = arith.cmpi eq, %arg0, %c0_i32_14 : i32
    %25 = arith.extui %24 : i1 to i32
    %c0_i32_15 = arith.constant 0 : i32
    %26 = arith.cmpi ne, %25, %c0_i32_15 : i32
    scf.if %26 {
      %c0_16 = arith.constant 0 : index
      %c0_17 = arith.constant 0 : index
      %27 = vector.load %arg6[%c0_16, %c0_17] : memref<8x128xf32, #tpu.memory_space<vmem>>, vector<8x128xf32>
      %28 = vector.shape_cast %27 : vector<8x128xf32> to vector<1x8x128xf32>
      %cst_18 = arith.constant dense<0.000000e+00> : vector<1xf32>
      %29 = vector.multi_reduction <add>, %28, %cst_18 [1, 2] : vector<1x8x128xf32> to vector<1xf32>
      %30 = vector.shape_cast %29 : vector<1xf32> to vector<1x1x1xf32>
      %31 = vector.extract %30[0, 0, 0] : f32 from vector<1x1x1xf32>
      %c0_19 = arith.constant 0 : index
      %32 = memref.load %arg5[%c0_19] : memref<2xf32, #tpu.memory_space<smem>>
      memref.store %31, %arg5[%c0_19] : memref<2xf32, #tpu.memory_space<smem>>
      %c0_20 = arith.constant 0 : index
      %c0_21 = arith.constant 0 : index
      %33 = vector.load %arg7[%c0_20, %c0_21] : memref<8x128xf32, #tpu.memory_space<vmem>>, vector<8x128xf32>
      %34 = vector.shape_cast %33 : vector<8x128xf32> to vector<1x8x128xf32>
      %cst_22 = arith.constant dense<0.000000e+00> : vector<1xf32>
      %35 = vector.multi_reduction <add>, %34, %cst_22 [1, 2] : vector<1x8x128xf32> to vector<1xf32>
      %36 = vector.shape_cast %35 : vector<1xf32> to vector<1x1x1xf32>
      %37 = vector.extract %36[0, 0, 0] : f32 from vector<1x1x1xf32>
      %c1 = arith.constant 1 : index
      %38 = memref.load %arg5[%c1] : memref<2xf32, #tpu.memory_space<smem>>
      memref.store %37, %arg5[%c1] : memref<2xf32, #tpu.memory_space<smem>>
    } else {
    }
    return
  }
  func.func @transform_0(%arg0: i32) -> (i32, i32) {
    %c0_i32 = arith.constant 0 : i32
    %0 = arith.minsi %arg0, %c0_i32 : i32
    %c0_i32_0 = arith.constant 0 : i32
    %c0_i32_1 = arith.constant 0 : i32
    return %0, %c0_i32_0 : i32, i32
  }
  func.func @transform_1(%arg0: i32) -> (i32, i32) {
    %c0_i32 = arith.constant 0 : i32
    %0 = arith.minsi %arg0, %c0_i32 : i32
    %c0_i32_0 = arith.constant 0 : i32
    %c0_i32_1 = arith.constant 0 : i32
    return %0, %c0_i32_0 : i32, i32
  }
  func.func @transform_2(%arg0: i32) -> (i32, i32) {
    %c0_i32 = arith.constant 0 : i32
    %0 = arith.minsi %arg0, %c0_i32 : i32
    %c0_i32_0 = arith.constant 0 : i32
    %c0_i32_1 = arith.constant 0 : i32
    return %0, %c0_i32_0 : i32, i32
  }
  func.func @transform_3(%arg0: i32) -> (i32, i32) {
    %c0_i32 = arith.constant 0 : i32
    %0 = arith.minsi %arg0, %c0_i32 : i32
    %c0_i32_0 = arith.constant 0 : i32
    %c0_i32_1 = arith.constant 0 : i32
    return %0, %c0_i32_0 : i32, i32
  }
  func.func @transform_4(%arg0: i32) -> i32 {
    %c0_i32 = arith.constant 0 : i32
    %c0_i32_0 = arith.constant 0 : i32
    return %c0_i32 : i32
  }
}

</mosaic_0001>

<bundles_post_ra>
// kernel: vae_step_losses.1
= control target key start
LH: loop header
LB: loop body
LE: loop exit
PB: predicated region body
PF: predicated region fallthrough
CT: control target
= control target key end

     0   :  { %v51_v3 = vlaneseq  ;;  %s278_s0 = inlined_call_operand.vmem [shape: f32[12,128], index: 0, kind: input, shape index: {}]   ;;  %s279_s1 = inlined_call_operand.vmem [shape: f32[12,128], index: 1, kind: input, shape index: {}]   ;;  %s280_s2 = inlined_call_operand.vmem [shape: f32[48,128], index: 2, kind: input, shape index: {}]   ;;  %s281_s3 = inlined_call_operand.vmem [shape: f32[48,128], index: 3, kind: input, shape index: {}]   ;;  %s282_s4 = inlined_call_operand.vmem [shape: f32[2], index: 4, kind: output, shape index: {}]  }
   0x1   :  { %v43_v0 = vld [vmem:[%s278_s0] sm:$0xff]  ;;  %v44_v1 = vld [vmem:[%s278_s0 + $0x8] sm:$0xff] }
   0x2   :  { %v45_v2 = vld [vmem:[%s279_s1] sm:$0xff]  ;;  %v46_v4 = vld [vmem:[%s279_s1 + $0x8] sm:$0xff]  ;;  %v52_v7 = vshrl.u32 %v51_v3, 7 }
   0x3   :  { %v47_v5 = vsub.f32 %v43_v0, %v45_v2  ;;  %v48_v6 = vsub.f32 %v44_v1, %v46_v4  ;;  %v73_v11 = vld [vmem:[%s281_s3] sm:$0xff]  ;;  %v74_v12 = vld [vmem:[%s281_s3 + $0x8] sm:$0xff] }
   0x4   :  { %v53_v10 = vadd.s32 8, %v52_v7 }
   0x5   :  { %v49_v8 = vmul.f32 %v47_v5, %v47_v5  ;;  %v50_v9 = vmul.f32 %v48_v6, %v48_v6 }
   0x6   :  { %9 = vsyncpa [#allocation5], 0  ;;  %vm60_vm0 = vcmp.lt.s32.totalorder %v53_v10, 12  ;;  %v75_v13 = vld [vmem:[%s281_s3 + $0x10] sm:$0xff]  ;;  %v76_v14 = vld [vmem:[%s281_s3 + $0x18] sm:$0xff]  ;;  %v79_v29 = vadd.f32 1.0, %v73_v11 }
   0x7   :  { %v62_v15 = vsel %vm60_vm0, %v50_v9, 0.0  ;;  %v77_v16 = vld [vmem:[%s281_s3 + $0x20] sm:$0xff]  ;;  %v78_v18 = vld [vmem:[%s281_s3 + $0x28] sm:$0xff]  ;;  %v97_v19 = vmul.f32 1.442695, %v73_v11  ;;  %v69_v27 = vld [vmem:[%s280_s2 + $0x10] sm:$0xff] }
   0x8   :  { %v63_v17 = vadd.f32 %v62_v15, %v49_v8  ;;  %v99_v20 = vmul.f32 1.442695, %v74_v12  ;;  %v101_v21 = vmul.f32 1.442695, %v75_v13  ;;  %v103_v22 = vmul.f32 1.442695, %v76_v14 }
   0x9   :  { %175 = vpow2.f32 %v97_v19  ;;  %v105_v23 = vmul.f32 1.442695, %v77_v16  ;;  %v107_v24 = vmul.f32 1.442695, %v78_v18  ;;  %v67_v25 = vld [vmem:[%s280_s2] sm:$0xff]  ;;  %v68_v26 = vld [vmem:[%s280_s2 + $0x8] sm:$0xff]  ;;  %v87_v36 = vmul.f32 %v69_v27, %v69_v27 }
   0xa   :  { %132 = vadd.xlane.f32.xlu0 %v63_v17  ;;  %177 = vpow2.f32 %v99_v20  ;;  %v70_v28 = vld [vmem:[%s280_s2 + $0x18] sm:$0xff]  ;;  %v85_v30 = vmul.f32 %v67_v25, %v67_v25  ;;  %v71_v31 = vld [vmem:[%s280_s2 + $0x20] sm:$0xff]  ;;  %v80_v32 = vadd.f32 1.0, %v74_v12  ;;  %v86_v33 = vmul.f32 %v68_v26, %v68_v26  ;;  %v72_v34 = vld [vmem:[%s280_s2 + $0x28] sm:$0xff]  ;;  %s161_s20 = sshll.u32 %s282_s4, 4  ;;  %s162_s20 = int_to_ptr.vmem [resolvable:$true] %s161_s20 }
   0xb   :  { %179 = vpow2.f32 %v101_v21  ;;  %v81_v35 = vadd.f32 1.0, %v75_v13  ;;  %v82_v37 = vadd.f32 1.0, %v76_v14  ;;  %v88_v38 = vmul.f32 %v70_v28, %v70_v28  ;;  %s187_s22 = scalar_lea.vmem %s162_s20, 16  ;;  %p192_p1 = scmp.lt.s32.totalorder %s162_s20, %s162_s20 }
   0xc   :  { %181 = vpow2.f32 %v103_v22  ;;  %v83_v39 = vadd.f32 1.0, %v77_v16  ;;  %v89_v40 = vmul.f32 %v71_v31, %v71_v31  ;;  %v91_v41 = vsub.f32 %v79_v29, %v85_v30  ;;  %p188_p0 = scmp.ne.s32.totalorder %s162_s20, %s187_s22  ;;  %p193_p2 = scmp.lt.s32.totalorder %s187_s22, %s187_s22 }
   0xd   :  { %183 = vpow2.f32 %v105_v23  ;;  %v84_v42 = vadd.f32 1.0, %v78_v18  ;;  %v90_v43 = vmul.f32 %v72_v34, %v72_v34  ;;  %v92_v44 = vsub.f32 %v80_v32, %v86_v33 }
   0xe   :  { %185 = vpow2.f32 %v107_v24  ;;  %v93_v45 = vsub.f32 %v81_v35, %v87_v36  ;;  %v94_v47 = vsub.f32 %v82_v37, %v88_v38  ;;  %v95_v49 = vsub.f32 %v83_v39, %v89_v40  ;;  %p194_p3 = por %p193_p2, %p192_p1 }
   0xf   :  { %v96_v52 = vsub.f32 %v84_v42, %v90_v43 }
  0x10   :  { %p195_p4 = pnand %p194_p3, %p188_p0 }
  0x16   :  { %v176_v46 = vpop.eup %175 }
  0x17   :  { %v178_v48 = vpop.eup %177  ;;  %v109_v50 = vsub.f32 %v91_v41, %v176_v46 }
  0x18   :  { %v180_v51 = vpop.eup %179  ;;  %v110_v53 = vsub.f32 %v92_v44, %v178_v48 }
  0x19   :  { %v182_v54 = vpop.eup %181  ;;  %v111_v55 = vsub.f32 %v93_v45, %v180_v51  ;;  %v115_v56 = vmul.f32 -0.5, %v109_v50 }
  0x1a   :  { %v184_v57 = vpop.eup %183  ;;  %v112_v58 = vsub.f32 %v94_v47, %v182_v54  ;;  %v116_v59 = vmul.f32 -0.5, %v110_v53 }
  0x1b   :  { %v186_v60 = vpop.eup %185  ;;  %v113_v61 = vsub.f32 %v95_v49, %v184_v57  ;;  %v117_v62 = vmul.f32 -0.5, %v111_v55 }
  0x1c   :  { %v114_v63 = vsub.f32 %v96_v52, %v186_v60  ;;  %v118_v0 = vmul.f32 -0.5, %v112_v58  ;;  %v121_v1 = vadd.f32 %v116_v59, %v115_v56 }
  0x1d   :  { %v119_v2 = vmul.f32 -0.5, %v113_v61 }
  0x1e   :  { %v122_v3 = vadd.f32 %v121_v1, %v117_v62  ;;  %v120_v4 = vmul.f32 -0.5, %v114_v63 }
  0x20   :  { %v123_v5 = vadd.f32 %v122_v3, %v118_v0 }
  0x22   :  { %v124_v6 = vadd.f32 %v123_v5, %v119_v2 }
  0x24   :  { %v125_v7 = vadd.f32 %v124_v6, %v120_v4 }
  0x26   :  { %144 = vadd.xlane.f32.xlu0 %v125_v7 }
  0x93   :  { %v133_v8 = vpop.xlane.xlu0 %132 }
  0x94   :  { %v134_v9 = vrot.slane %v133_v8, 4 }
  0x96   :  { %v135_v10 = vadd.f32 %v134_v9, %v133_v8 }
  0x98   :  { %v136_v11 = vrot.slane %v135_v10, 2 }
  0x9a   :  { %v137_v12 = vadd.f32 %v136_v11, %v135_v10 }
  0x9c   :  { %v138_v13 = vrot.slane %v137_v12, 1 }
  0x9e   :  { %v139_v14 = vadd.f32 %v138_v13, %v137_v12 }
  0xa0   :  { %170 = vpush %v139_v14 }
  0xaf   :  { %v145_v15 = vpop.xlane.xlu0 %144 }
  0xb0   :  { %v146_v16 = vrot.slane %v145_v15, 4 }
  0xb2   :  { %v147_v17 = vadd.f32 %v146_v16, %v145_v15 }
  0xb4   :  { %v148_v18 = vrot.slane %v147_v17, 2 }
  0xb6   :  { %v149_v19 = vadd.f32 %v148_v18, %v147_v17 }
  0xb8   :  { %v150_v20 = vrot.slane %v149_v19, 1 }
  0xba   :  { %v151_v21 = vadd.f32 %v150_v20, %v149_v19 }
  0xbc   :  { %172 = vpush %v151_v21 }
  0xd1   :  { %s171_s2 = spop %170 }
  0xd2   :  { %142 = sst [smem:[#allocation4]] %s171_s2 }
  0xed   :  { %s173_s21 = spop %172 }
  0xee   :  { %154 = sst [smem:[#allocation4 + $0x1]] %s173_s21 }
  0xef   :  { %198 = shalt.err (!%p195_p4)
}
  0xf0   :  { %s201_s23 = smov [#allocation4]  }
  0xf1   :  { %164 = dma.smem_to_vmem %s201_s23, 16, %s162_s20, [#allocation5]  }
  0xf2   :  { %199 = dma.done.wait [#allocation5], 16  }
  0xf3   :  { %200 = vsyncadd [#allocation5], 4294967280 }
  0xf4   :  { %168 = sfence }
  0xf5   :  { %169 = vsyncpa [#allocation5], 1 }

</bundles_post_ra>
